<compile_context>
chip_gen: v7x
topology: tpu7x:2x2x1
jax: 0.10.0
libtpu: 0.0.40
codegen_flags: <defaults>
</compile_context>

<pallas_src>
import functools

import jax
import jax.numpy as jnp
from jax.experimental import pallas as pl
from jax.experimental.pallas import tpu as pltpu


def to_2tuple(x):
    if isinstance(x, (tuple, list)):
        return tuple(x)
    return (x, x)


def _round_up(x, m):
    return (x + m - 1) // m * m


def _largest_divisor_tile(dim, target, mult):
    """Largest multiple of `mult` that divides `dim` and is <= target (>= mult)."""
    best = mult
    t = mult
    while t <= dim and t <= target:
        if dim % t == 0:
            best = t
        t += mult
    return best


# ----------------------------- Pallas kernels ------------------------------


def _proj_kernel(p_ref, w_ref, b_ref, o_ref):
    # p: (tm, K) bf16, w: (K, tn) bf16, b: (1, tn) f32, o: (tm, tn) f32
    acc = jnp.dot(p_ref[...], w_ref[...], preferred_element_type=jnp.float32)
    o_ref[...] = (acc + b_ref[...]).astype(o_ref.dtype)


def _proj_norm_kernel(p_ref, w_ref, b_ref, g_ref, beta_ref, o_ref, *, eps, e_valid):
    # Fused conv-projection + LayerNorm over the (valid part of the) embed axis.
    # Padded columns of w/b are exactly zero, so acc is zero there and the
    # single-pass sums below only need rescaling by 1/e_valid (not 1/tn).
    acc = jnp.dot(p_ref[...], w_ref[...], preferred_element_type=jnp.float32)
    acc = acc + b_ref[...]
    inv_e = 1.0 / float(e_valid)
    s1 = jnp.sum(acc, axis=-1, keepdims=True)
    s2 = jnp.sum(acc * acc, axis=-1, keepdims=True)
    mean = s1 * inv_e
    var = s2 * inv_e - mean * mean          # single reduction pass over acc
    y = (acc - mean) * jax.lax.rsqrt(var + eps)   # rsqrt -> EUP slot
    o_ref[...] = (y * g_ref[...] + beta_ref[...]).astype(o_ref.dtype)


def _pallas_patch_project(patches, w_t, bias, gamma=None, beta=None, *,
                          eps=1e-5, tile_m_target=512, tile_n_target=512):
    """patches (M, K), w_t (K, E), bias (E,) -> (M, E) float32."""
    M, K = patches.shape
    E = w_t.shape[1]
    with_norm = gamma is not None

    # Lane-dense embedding axis; MXU-friendly row tiles.
    Ep = _round_up(E, 128)
    tile_m = min(tile_m_target, _round_up(M, 8))
    Mp = _round_up(M, tile_m)
    if with_norm:
        tile_n = Ep                      # LayerNorm needs the full embed axis.
    else:
        tile_n = _largest_divisor_tile(Ep, tile_n_target, 128)

    # bf16 operands (MXU peak, half the HBM traffic); f32 accumulation in-kernel.
    p_pad = jnp.pad(patches.astype(jnp.bfloat16), ((0, Mp - M), (0, 0)))
    w_pad = jnp.pad(w_t.astype(jnp.bfloat16), ((0, 0), (0, Ep - E)))
    b_pad = jnp.pad(bias.reshape(1, E).astype(jnp.float32), ((0, 0), (0, Ep - E)))

    grid = (Mp // tile_m, Ep // tile_n)
    in_specs = [
        pl.BlockSpec((tile_m, K), lambda i, j: (i, 0)),
        pl.BlockSpec((K, tile_n), lambda i, j: (0, j)),
        pl.BlockSpec((1, tile_n), lambda i, j: (0, j)),
    ]
    extra_in = []
    if with_norm:
        kernel = functools.partial(_proj_norm_kernel, eps=eps, e_valid=E)
        g_pad = jnp.pad(gamma.reshape(1, E).astype(jnp.float32),
                        ((0, 0), (0, Ep - E)))
        be_pad = jnp.pad(beta.reshape(1, E).astype(jnp.float32),
                         ((0, 0), (0, Ep - E)))
        extra_in = [g_pad, be_pad]
        in_specs += [
            pl.BlockSpec((1, tile_n), lambda i, j: (0, j)),
            pl.BlockSpec((1, tile_n), lambda i, j: (0, j)),
        ]
    else:
        kernel = _proj_kernel

    # VMEM audit: double-buffered inputs + outputs.  Only raise the scoped
    # limit when the default would actually be tight.
    vmem_est = 2 * (tile_m * K * 2 + K * tile_n * 2
                    + (3 if with_norm else 1) * tile_n * 4
                    + tile_m * tile_n * 4)
    vmem_limit = None
    if vmem_est > (12 << 20):
        vmem_limit = min(2 * vmem_est + (1 << 20), 48 << 20)

    cost = pl.CostEstimate(
        flops=2 * Mp * K * Ep,
        transcendentals=Mp if with_norm else 0,
        bytes_accessed=Mp * K * 2 + K * Ep * 2 + Mp * Ep * 4,
    )

    out = pl.pallas_call(
        kernel,
        out_shape=jax.ShapeDtypeStruct((Mp, Ep), jnp.float32),
        grid_spec=pltpu.PrefetchScalarGridSpec(
            num_scalar_prefetch=0,
            grid=grid,
            in_specs=in_specs,
            out_specs=pl.BlockSpec((tile_m, tile_n), lambda i, j: (i, j)),
        ),
        compiler_params=pltpu.CompilerParams(
            dimension_semantics=("parallel", "parallel"),
            vmem_limit_bytes=vmem_limit),
        cost_estimate=cost,
    )(p_pad, w_pad, b_pad, *extra_in)

    return out[:M, :E]


# ------------------------------ PatchEmbed ---------------------------------


class PatchEmbed:
    """JAX/Pallas port of the PyTorch PatchEmbed module."""

    def __init__(self, img_size=(16, 16), patch_size=4, patch_count=(4, 4),
                 in_chans=4, embed_dim=32, with_norm=False, key=None):
        patch_stride = [img_size[0] // patch_count[0],
                        img_size[1] // patch_count[1]]
        patch_pad_h = (patch_stride[0] * (patch_count[0] - 1)
                       + patch_size - img_size[0]) // 2
        patch_pad_w = (patch_stride[1] * (patch_count[1] - 1)
                       + patch_size - img_size[1]) // 2
        patch_pad = [patch_pad_h, patch_pad_w]

        self.img_size = to_2tuple(img_size)
        self.patch_size = to_2tuple(patch_size)
        self.num_patches = patch_count[0] * patch_count[1]
        # NOTE: the PyTorch module passes scalar stride/padding to Conv2d, so
        # *both* spatial dims use patch_stride[0] / patch_pad[0].  Reproduce that.
        self.stride = patch_stride[0]
        self.pad = patch_pad[0]
        self.in_chans = in_chans
        self.embed_dim = embed_dim
        self.with_norm = with_norm

        # Deterministic parameter init (synthetic; mirrors Conv2d/LayerNorm shapes).
        if key is None:
            key = jax.random.PRNGKey(42)
        kw, kb = jax.random.split(key)
        kh, kw_ = self.patch_size
        # Conv2d weight: (E, C, kh, kw); bias: (E,)
        self.proj_w = (0.02 * jax.random.normal(
            kw, (embed_dim, in_chans, kh, kw_), dtype=jnp.float32))
        self.proj_b = (0.02 * jax.random.normal(
            kb, (embed_dim,), dtype=jnp.float32))
        if with_norm:
            self.norm_gamma = jnp.ones((embed_dim,), jnp.float32)
            self.norm_beta = jnp.zeros((embed_dim,), jnp.float32)

    def __call__(self, x):
        B, C, H, W = x.shape
        assert H == self.img_size[0] and W == self.img_size[1], (
            f"Input image size ({H}*{W}) doesn't match model "
            f"({self.img_size[0]}*{self.img_size[1]}).")
        kh, kw = self.patch_size
        s, p = self.stride, self.pad

        Hp, Wp = H + 2 * p, W + 2 * p
        oh = (Hp - kh) // s + 1
        ow = (Wp - kw) // s + 1
        assert oh * ow == self.num_patches
        K = C * kh * kw

        if p == 0 and s == kh and s == kw and H % s == 0 and W % s == 0:
            # Non-overlapping patches: im2col is a pure reshape + transpose
            # (no gather kernel, no padded copy of x).
            patches = x.reshape(B, C, oh, kh, ow, kw)
            patches = jnp.transpose(patches, (0, 2, 4, 1, 3, 5))
            patches = patches.reshape(B * self.num_patches, K)
        else:
            # TODO(synk): overlapping/padded case still materializes the
            # (B*N, K) im2col buffer via an XLA gather; folding it into the
            # kernel needs a manual DMA gather (memory_space=pl.ANY).
            x_pad = jnp.pad(x, ((0, 0), (0, 0), (p, p), (p, p)))
            row_idx = (jnp.arange(oh) * s)[:, None] + jnp.arange(kh)[None, :]
            col_idx = (jnp.arange(ow) * s)[:, None] + jnp.arange(kw)[None, :]
            patches = x_pad[:, :, row_idx[:, :, None, None],
                            col_idx[None, None, :, :]]
            patches = jnp.transpose(patches, (0, 2, 4, 1, 3, 5))
            patches = patches.reshape(B * self.num_patches, K)

        # Conv weight (E, C, kh, kw) -> (K, E); matches patch flattening order.
        w_t = self.proj_w.reshape(self.embed_dim, K).T

        gamma = self.norm_gamma if self.with_norm else None
        beta = self.norm_beta if self.with_norm else None
        out = _pallas_patch_project(patches, w_t, self.proj_b, gamma, beta)

        out = out.reshape(B, self.num_patches, self.embed_dim)
        assert out.shape[1] == self.num_patches
        return out


# ------------------------------ reference ----------------------------------


def _reference(pe: PatchEmbed, x):
    """Pure-JAX f32 reference using lax conv, for correctness checking only."""
    y = jax.lax.conv_general_dilated(
        x.astype(jnp.float32), pe.proj_w,
        window_strides=(pe.stride, pe.stride),
        padding=((pe.pad, pe.pad), (pe.pad, pe.pad)),
        dimension_numbers=("NCHW", "OIHW", "NCHW"))
    y = y + pe.proj_b[None, :, None, None]
    B = x.shape[0]
    y = y.reshape(B, pe.embed_dim, -1).transpose(0, 2, 1)
    if pe.with_norm:
        mean = jnp.mean(y, axis=-1, keepdims=True)
        var = jnp.mean((y - mean) ** 2, axis=-1, keepdims=True)
        y = (y - mean) * jax.lax.rsqrt(var + 1e-5)
        y = y * pe.norm_gamma + pe.norm_beta
    return y


if __name__ == "__main__":
    key = jax.random.PRNGKey(0)
    # Small shapes consistent with the module: img 16x16, patch 4, count 4x4.
    B, C, H, W = 2, 4, 16, 16
    x = jax.random.normal(key, (B, C, H, W), dtype=jnp.float32)

    # Plain projection path.
    pe = PatchEmbed(img_size=(H, W), patch_size=4, patch_count=(4, 4),
                    in_chans=C, embed_dim=32, with_norm=False,
                    key=jax.random.PRNGKey(1))
    out = jax.block_until_ready(pe(x))
    assert out.shape == (B, pe.num_patches, pe.embed_dim), out.shape
    ref = jax.block_until_ready(_reference(pe, x))
    # bf16 operands (f32 accumulation) -> compare at bf16-level tolerance.
    assert jnp.allclose(out, ref, atol=2e-2, rtol=2e-2), (
        float(jnp.max(jnp.abs(out - ref))))

    # Fused-LayerNorm path.
    pe_n = PatchEmbed(img_size=(H, W), patch_size=4, patch_count=(4, 4),
                      in_chans=C, embed_dim=32, with_norm=True,
                      key=jax.random.PRNGKey(2))
    out_n = jax.block_until_ready(pe_n(x))
    ref_n = jax.block_until_ready(_reference(pe_n, x))
    assert out_n.shape == (B, pe_n.num_patches, pe_n.embed_dim), out_n.shape
    assert jnp.allclose(out_n, ref_n, atol=5e-2, rtol=5e-2), (
        float(jnp.max(jnp.abs(out_n - ref_n))))

    print("KERNEL_OK")
</pallas_src>

<mosaic_0001>
module attributes {stable_mosaic.version = 11 : i64} {
  func.func @_proj_kernel(%arg0: i32, %arg1: i32, %arg2: memref<32x64xbf16, #tpu.memory_space<vmem>>, %arg3: memref<64x128xbf16, #tpu.memory_space<vmem>>, %arg4: memref<1x128xf32, #tpu.memory_space<vmem>>, %arg5: memref<32x128xf32, #tpu.memory_space<vmem>>) attributes {dimension_semantics = [#tpu.dimension_semantics<parallel>, #tpu.dimension_semantics<parallel>], iteration_bounds = array<i64: 1, 1>, scalar_prefetch = 0 : i64, scratch_operands = 0 : i64, tpu.core_type = #tpu.core_type<tc>, window_params = [{transform_indices = @transform_0, window_bounds = array<i64: 32, 64>}, {transform_indices = @transform_1, window_bounds = array<i64: 64, 128>}, {transform_indices = @transform_2, window_bounds = array<i64: 1, 128>}, {transform_indices = @transform_3, window_bounds = array<i64: 32, 128>}]} {
    %c0 = arith.constant 0 : index
    %c0_0 = arith.constant 0 : index
    %0 = vector.load %arg2[%c0, %c0_0] : memref<32x64xbf16, #tpu.memory_space<vmem>>, vector<32x64xbf16>
    %c0_1 = arith.constant 0 : index
    %c0_2 = arith.constant 0 : index
    %1 = vector.load %arg3[%c0_1, %c0_2] : memref<64x128xbf16, #tpu.memory_space<vmem>>, vector<64x128xbf16>
    %cst = arith.constant dense<0.000000e+00> : vector<32x128xf32>
    %2 = tpu.matmul %0, %1, %cst {dimension_numbers = #tpu.dot_dimension_numbers<[1], [0], [0], [1], [0, 0, 1, 1], [], []>} : vector<32x64xbf16>, vector<64x128xbf16>, vector<32x128xf32> -> vector<32x128xf32>
    %c0_3 = arith.constant 0 : index
    %c0_4 = arith.constant 0 : index
    %3 = vector.load %arg4[%c0_3, %c0_4] : memref<1x128xf32, #tpu.memory_space<vmem>>, vector<1x128xf32>
    %4 = vector.broadcast %3 : vector<1x128xf32> to vector<32x128xf32>
    %5 = arith.addf %2, %4 : vector<32x128xf32>
    %c0_5 = arith.constant 0 : index
    %c0_6 = arith.constant 0 : index
    %6 = vector.load %arg5[%c0_5, %c0_6] : memref<32x128xf32, #tpu.memory_space<vmem>>, vector<32x128xf32>
    tpu.vector_store %arg5[%c0_5, %c0_6], %5 {strides = array<i32>} : memref<32x128xf32, #tpu.memory_space<vmem>>, vector<32x128xf32>,
    return
  }
  func.func @transform_0(%arg0: i32, %arg1: i32) -> (i32, i32) {
    %c0_i32 = arith.constant 0 : i32
    %c0_i32_0 = arith.constant 0 : i32
    return %arg0, %c0_i32 : i32, i32
  }
  func.func @transform_1(%arg0: i32, %arg1: i32) -> (i32, i32) {
    %c0_i32 = arith.constant 0 : i32
    %c0_i32_0 = arith.constant 0 : i32
    return %c0_i32, %arg1 : i32, i32
  }
  func.func @transform_2(%arg0: i32, %arg1: i32) -> (i32, i32) {
    %c0_i32 = arith.constant 0 : i32
    %c0_i32_0 = arith.constant 0 : i32
    return %c0_i32, %arg1 : i32, i32
  }
  func.func @transform_3(%arg0: i32, %arg1: i32) -> (i32, i32) {
    %c0_i32 = arith.constant 0 : i32
    return %arg0, %arg1 : i32, i32
  }
}

</mosaic_0001>

<bundles_post_ra>
// kernel: tpu_custom_call.1
= control target key start
LH: loop header
LB: loop body
LE: loop exit
PB: predicated region body
PF: predicated region fallthrough
CT: control target
= control target key end

     0   :  { %8 = vsyncpa [#allocation3], 0  ;;  %s353_s0 = inlined_call_operand.hbm [shape: bf16[32,64], index: 0, kind: input, shape index: {}]   ;;  %s354_s1 = inlined_call_operand.hbm [shape: bf16[64,128], index: 1, kind: input, shape index: {}]   ;;  %s355_s2 = inlined_call_operand.vmem [shape: f32[1,128], index: 2, kind: input, shape index: {}]   ;;  %s356_s3 = inlined_call_operand.hbm [shape: f32[32,128], index: 3, kind: output, shape index: {}]  }
   0x1   :  { %9 = vsyncpa [#allocation6], 0 }
   0x2   :  { %10 = vsyncpa [#allocation4], 0  ;;  %s287_s12 = smov [#allocation2]   ;;  %s215_s16 = scalar_lea.hbm %s353_s0, 256 }
   0x3   :  { %s16_s13 = sshll.u32 %s287_s12, 4  ;;  %p216_p0 = scmp.ne.s32.totalorder %s353_s0, %s215_s16  ;;  %s17_s13 = int_to_ptr.vmem [resolvable:$true] %s16_s13 }
   0x4   :  { %p219_p1 = scmp.lt.u32.totalorder %s215_s16, %s353_s0 }
   0x6   :  { %p221_p2 = pnand %p219_p1, %p216_p0 }
   0x8   :  { %224 = shalt.err (!%p221_p2)
}
   0x9   :  { %s225_s21 = scalar_lea.vmem %s17_s13, 256  ;;  %p230_p4 = scmp.lt.s32.totalorder %s17_s13, %s17_s13 }
   0xa   :  { %p226_p3 = scmp.ne.s32.totalorder %s17_s13, %s225_s21  ;;  %p231_p5 = scmp.lt.s32.totalorder %s225_s21, %s225_s21 }
   0xc   :  { %p232_p6 = por %p231_p5, %p230_p4 }
   0xe   :  { %p233_p7 = pnand %p232_p6, %p226_p3 }
  0x10   :  { %236 = shalt.err (!%p233_p7)
}
  0x11   :  { %s288_s22 = smov 64   ;;  %s289_s23 = smov 4  }
  0x12   :  { %22 = dma.hbm_to_vmem [thread:$0]  %s353_s0, 256, %s17_s13, [#allocation3], %s288_s22, %s288_s22, %s289_s23  }
  0x13   :  { %s290_s26 = smov [#allocation5]   ;;  %s237_s30 = scalar_lea.hbm %s354_s1, 512 }
  0x14   :  { %s28_s27 = sshll.u32 %s290_s26, 4  ;;  %p238_p8 = scmp.ne.s32.totalorder %s354_s1, %s237_s30  ;;  %s29_s27 = int_to_ptr.vmem [resolvable:$true] %s28_s27 }
  0x15   :  { %p241_p9 = scmp.lt.u32.totalorder %s237_s30, %s354_s1 }
  0x17   :  { %p243_p10 = pnand %p241_p9, %p238_p8 }
  0x19   :  { %246 = shalt.err (!%p243_p10)
}
  0x1a   :  { %s247_s8 = scalar_lea.vmem %s29_s27, 512  ;;  %p252_p12 = scmp.lt.s32.totalorder %s29_s27, %s29_s27 }
  0x1b   :  { %p248_p11 = scmp.ne.s32.totalorder %s29_s27, %s247_s8  ;;  %p253_p13 = scmp.lt.s32.totalorder %s247_s8, %s247_s8 }
  0x1d   :  { %p254_p0 = por %p253_p13, %p252_p12 }
  0x1f   :  { %p255_p1 = pnand %p254_p0, %p248_p11 }
  0x21   :  { %258 = shalt.err (!%p255_p1)
}
  0x22   :  { %34 = dma.hbm_to_vmem [thread:$0]  %s354_s1, 512, %s29_s27, [#allocation6], %s288_s22, %s288_s22, %s289_s23  }
  0x23   :  { %281 = dma.done.wait [#allocation3], 256  }
  0x24   :  { %282 = vsyncadd [#allocation3], 4294967040 }
  0x25   :  { %283 = dma.done.wait [#allocation6], 512  }
  0x26   :  { %284 = vsyncadd [#allocation6], 4294966784  ;;  %v209_v0 = vld [vmem:[#allocation5] sm:$0xff]   ;;  %v210_v1 = vld [vmem:[#allocation5 + $0x8] sm:$0xff]   ;;  %vm97_vm0 = vcmask 523264   ;;  %s291_s11 = smov [#allocation7]  }
  0x27   :  { %190 = vmatprep.subr.bf16.mxu0 %v209_v0  ;;  %v211_v2 = vld [vmem:[#allocation5 + $0x10] sm:$0xff]   ;;  %v212_v4 = vld [vmem:[#allocation5 + $0x18] sm:$0xff]   ;;  %s162_s12 = sshll.u32 %s291_s11, 4  ;;  %s163_s12 = int_to_ptr.vmem [resolvable:$true] %s162_s12 }
  0x28   :  { %191 = vmatpush3.bf16.msra.mxu0 %v209_v0  ;;  %v213_v3 = vld [vmem:[#allocation2] sm:$0xff]   ;;  %v214_v5 = vld [vmem:[#allocation2 + $0x8] sm:$0xff]   ;;  %s259_s13 = scalar_lea.vmem %s163_s12, 512  ;;  %p264_p3 = scmp.lt.s32.totalorder %s163_s12, %s163_s12 }
  0x29   :  { %192 = vmatprep.subr.bf16.mxu0 %v210_v1  ;;  %198 = vmatprep.mubr.msk.bf16.mxu0 %vm97_vm0, %v213_v3  ;;  %v175_v6 = vld [vmem:[%s355_s2] ss:$0 sm:$0xff]  ;;  %p260_p2 = scmp.ne.s32.totalorder %s163_s12, %s259_s13  ;;  %p265_p4 = scmp.lt.s32.totalorder %s259_s13, %s259_s13 }
  0x2b   :  { %p266_p5 = por %p265_p4, %p264_p3 }
  0x2c   :  { %193 = vmatpush3.bf16.msra.mxu0 %v210_v1 }
  0x2d   :  { %194 = vmatprep.subr.bf16.mxu0 %v211_v2  ;;  %p267_p6 = pnand %p266_p5, %p260_p2 }
  0x30   :  { %195 = vmatpush3.bf16.msra.mxu0 %v211_v2 }
  0x31   :  { %196 = vmatprep.subr.bf16.mxu0 %v212_v4 }
  0x34   :  { %197 = vmatpush3.bf16.msra.mxu0 %v212_v4 }
  0x37   :  { %199 = vmatmul.mubr.msk.bf16.vlgmr.msra.gmra.mrb[0].mxu0 %vm97_vm0, %v214_v5 }
 0x10a   :  { %v200_v7 = vpop.f32.mrb[0].mxu0 }
 0x10b   :  { %v147_v8 = vadd.f32 %v200_v7, %v175_v6  ;;  %v138_v9 = vpop.f32.mrb[1].mxu0 }
 0x10c   :  { %v139_v10 = vadd.f32 %v175_v6, %v138_v9  ;;  %v201_v11 = vpop.f32.mrb[2].mxu0 }
 0x10d   :  { %155 = vst [vmem:[#allocation7 + $0x10] sm:$0xff] %v147_v8  ;;  %v150_v12 = vadd.f32 %v201_v11, %v175_v6  ;;  %v141_v13 = vpop.f32.mrb[3].mxu0 }
 0x10e   :  { %153 = vst [vmem:[#allocation7] sm:$0xff] %v139_v10  ;;  %v142_v14 = vadd.f32 %v175_v6, %v141_v13 }
 0x10f   :  { %156 = vst [vmem:[#allocation7 + $0x18] sm:$0xff] %v150_v12 }
 0x110   :  { %154 = vst [vmem:[#allocation7 + $0x8] sm:$0xff] %v142_v14 }
 0x111   :  { %270 = shalt.err (!%p267_p6)
}
 0x112   :  { %s271_s15 = scalar_lea.hbm %s356_s3, 512 }
 0x113   :  { %p272_p7 = scmp.ne.s32.totalorder %s356_s3, %s271_s15  ;;  %p275_p8 = scmp.lt.u32.totalorder %s271_s15, %s356_s3 }
 0x115   :  { %p277_p9 = pnand %p275_p8, %p272_p7 }
 0x117   :  { %280 = shalt.err (!%p277_p9)
}
 0x118   :  { %s292_s20 = smov 128   ;;  %s293_s21 = smov 8  }
 0x119   :  { %168 = dma.vmem_to_hbm [thread:$0]  %s163_s12, 512, %s356_s3, [#allocation4], %s292_s20, %s292_s20, %s293_s21  }
 0x11a   :  { %285 = dma.done.wait [#allocation4], 512  }
 0x11b   :  { %286 = vsyncadd [#allocation4], 4294966784 }
 0x11c   :  { %172 = vsyncpa [#allocation3], 1 }
 0x11d   :  { %173 = vsyncpa [#allocation6], 1 }
 0x11e   :  { %174 = vsyncpa [#allocation4], 1 }

</bundles_post_ra>
